<compile_context>
chip_gen: v7x
topology: tpu7x:2x2x1
jax: 0.10.0
libtpu: 0.0.40
codegen_flags: <defaults>
</compile_context>

<pallas_src>
import jax
import jax.numpy as jnp
from jax.experimental import pallas as pl
from jax.experimental.pallas import tpu as pltpu


def _round_up(x, m):
    return ((x + m - 1) // m) * m


def _tpu_info():
    try:
        return pltpu.get_tpu_info()
    except Exception:
        return None


def _vmem_capacity_bytes():
    info = _tpu_info()
    v = getattr(info, "vmem_capacity_bytes", None) if info is not None else None
    if isinstance(v, int) and v > 0:
        return v
    return 64 * 2 ** 20  # conservative fallback = v7x per-TC physical VMEM


def _num_tensorcores():
    info = _tpu_info()
    if info is not None:
        for attr in ("num_cores", "num_tensorcores", "tensorcores_per_chip",
                     "cores_per_chip"):
            v = getattr(info, attr, None)
            if isinstance(v, int) and v > 0:
                return v
    v = getattr(jax.devices()[0], "num_cores", None)
    if isinstance(v, int) and v > 0:
        return v
    return 1  # safe default: v5e / v6e have one TensorCore per chip


def _ffn_kernel(x_ref, w1_ref, b1_ref, w2_ref, b2_ref, o_ref):
    # x_ref: (tm, H) tile of tokens; weights are fully resident (H, Hp)/(Hp, H).
    x = x_ref[...]                                   # f32, kept for the exact residual
    xm = x.astype(w1_ref.dtype)                      # bf16 (or f32) MXU operand
    h = jnp.dot(xm, w1_ref[...], preferred_element_type=jnp.float32) + b1_ref[...]
    h = jnp.maximum(h, 0.0)                          # ReLU in f32 (VPU)
    # TODO(synk): dropout1/dropout2 are identity (inference mode); training-mode
    # stochastic masking would use pltpu.prng_seed / pltpu.prng_random_bits.
    y = jnp.dot(h.astype(w2_ref.dtype), w2_ref[...],
                preferred_element_type=jnp.float32) + b2_ref[...]
    o_ref[...] = (y + x).astype(o_ref.dtype)


def _build_call(rows, H, Hp, tm, out_dtype, single_buffer_weights,
                vmem_limit_bytes, cost_estimate):
    def const_spec(shape):
        if single_buffer_weights:
            # Block index never changes across the grid: one VMEM buffer suffices,
            # halving the resident weight footprint (matters on v7x's 64 MiB VMEM).
            return pl.BlockSpec(shape, lambda i: (0, 0),
                                pipeline_mode=pl.Buffered(1))
        return pl.BlockSpec(shape, lambda i: (0, 0))

    return pl.pallas_call(
        _ffn_kernel,
        out_shape=jax.ShapeDtypeStruct((rows, H), out_dtype),
        grid_spec=pltpu.PrefetchScalarGridSpec(
            num_scalar_prefetch=0,
            grid=(pl.cdiv(rows, tm),),           # ragged last tile handled by Pallas
            in_specs=[
                pl.BlockSpec((tm, H), lambda i: (i, 0)),   # x tile (no HBM padding)
                const_spec((H, Hp)),                       # W1 (resident)
                const_spec((1, Hp)),                       # b1
                const_spec((Hp, H)),                       # W2 (resident)
                const_spec((1, H)),                        # b2
            ],
            out_specs=pl.BlockSpec((tm, H), lambda i: (i, 0)),
        ),
        compiler_params=pltpu.CompilerParams(
            dimension_semantics=("parallel",),
            vmem_limit_bytes=vmem_limit_bytes),
        cost_estimate=cost_estimate,
    )


def pointwise_feedforward(x, w1, b1, w2, b2, *, tm=None,
                          matmul_dtype=jnp.bfloat16, out_dtype=None):
    """x: (N, L, H).  w1, w2: (H, H) with y = x @ w (torch conv.weight[:,:,0].T).
    b1, b2: (H,).  out_dtype: optional reduced-precision output (e.g. bf16) to
    cut HBM write traffic; defaults to x.dtype (exact residual kept in f32)."""
    N, L, H = x.shape
    rows = N * L
    out_dtype = jnp.dtype(x.dtype) if out_dtype is None else jnp.dtype(out_dtype)

    # Lane-aligned intermediate dim; only the tiny weights are padded in HBM.
    Hp = _round_up(H, 128)

    x2d = x.reshape(rows, H)

    w_itemsize = jnp.dtype(matmul_dtype).itemsize
    x_itemsize = jnp.dtype(x.dtype).itemsize
    out_itemsize = out_dtype.itemsize
    weight_bytes = 2 * H * Hp * w_itemsize
    bias_bytes = (H + Hp) * 4

    # Per-generation VMEM budget with ~25% headroom for compiler-internal scratch:
    # ~48 MiB on v7x (64 MiB physical), ~96 MiB on v5e/v6e (128 MiB physical).
    vmem_budget = int(_vmem_capacity_bytes() * 3 // 4)

    if tm is None:
        # Row tile sized from the budget: double-buffered x + out tiles, one live
        # f32 intermediate (tm, Hp), weights/biases resident (assume worst-case 2x).
        per_row_bytes = 2 * H * (x_itemsize + out_itemsize) + Hp * 4
        act_budget = max(vmem_budget - 2 * (weight_bytes + bias_bytes),
                         8 * per_row_bytes)
        tm = min(1024, act_budget // per_row_bytes)
        tm = max(8, (tm // 8) * 8)
        tm = min(tm, _round_up(rows, 8))
        # Only split tiny grids when there really are >= 2 TensorCores (v7x);
        # on 1-TC chips halving just adds per-grid-step overhead.
        num_tc = _num_tensorcores()
        if num_tc > 1 and pl.cdiv(rows, tm) < num_tc and rows > 8 * num_tc:
            tm = max(8, _round_up(pl.cdiv(rows, num_tc), 8))

    def pad_w(w, rows_to, cols_to):
        return jnp.pad(w, ((0, rows_to - w.shape[0]),
                           (0, cols_to - w.shape[1]))).astype(matmul_dtype)

    w1p = pad_w(w1, H, Hp)                                   # extra output cols = 0
    w2p = pad_w(w2, Hp, H)                                   # extra contraction rows = 0
    b1p = jnp.pad(b1, (0, Hp - H)).reshape(1, Hp).astype(jnp.float32)
    b2p = b2.reshape(1, H).astype(jnp.float32)

    cost = pl.CostEstimate(
        flops=4 * rows * H * Hp,                             # two matmuls
        transcendentals=0,
        bytes_accessed=rows * H * (x_itemsize + out_itemsize)
        + weight_bytes + bias_bytes,
    )

    args = (x2d, w1p, b1p, w2p, b2p)
    try:
        out2d = _build_call(rows, H, Hp, tm, out_dtype, True,
                            vmem_budget, cost)(*args)
    except (TypeError, ValueError, NotImplementedError, pltpu.LoweringException):
        # Targeted fallback only for jax versions rejecting pl.Buffered(1) as a
        # pipeline mode; genuine VMEM/compile errors are not masked (they would
        # reproduce — with more VMEM pressure — in the double-buffered retry too).
        out2d = _build_call(rows, H, Hp, tm, out_dtype, False,
                            vmem_budget, cost)(*args)

    return out2d.reshape(N, L, H)


def reference(x, w1, b1, w2, b2):
    h = jnp.maximum(jnp.einsum("nlh,hk->nlk", x, w1) + b1, 0.0)
    return jnp.einsum("nlh,hk->nlk", h, w2) + b2 + x


if __name__ == "__main__":
    N, L, H = 2, 8, 32  # batch, seq, hidden_units
    key = jax.random.PRNGKey(0)
    kx, k1, k2, k3, k4 = jax.random.split(key, 5)

    x = jax.random.normal(kx, (N, L, H), dtype=jnp.float32)
    # Conv1d(H, H, kernel_size=1) weights: torch shape (H_out, H_in, 1).
    # We store the transposed (H_in, H_out) matrices directly.
    w1 = jax.random.normal(k1, (H, H), dtype=jnp.float32) * 0.05
    b1 = jax.random.normal(k2, (H,), dtype=jnp.float32) * 0.05
    w2 = jax.random.normal(k3, (H, H), dtype=jnp.float32) * 0.05
    b2 = jax.random.normal(k4, (H,), dtype=jnp.float32) * 0.05

    ref = reference(x, w1, b1, w2, b2)

    # Exact-precision path (f32 MXU operands): must match the reference tightly.
    out_f32 = jax.block_until_ready(
        pointwise_feedforward(x, w1, b1, w2, b2, matmul_dtype=jnp.float32))
    assert out_f32.shape == (N, L, H)
    assert jnp.allclose(out_f32, ref, atol=1e-5, rtol=1e-5), "f32 mismatch vs reference"

    # Default performance path (bf16 MXU operands, f32 accumulation/residual).
    out_bf16 = jax.block_until_ready(pointwise_feedforward(x, w1, b1, w2, b2))
    assert out_bf16.shape == (N, L, H)
    assert jnp.allclose(out_bf16, ref, atol=2e-2, rtol=2e-2), "bf16 mismatch vs reference"

    # Ragged row count + multi-step grid: exercises the cdiv grid and the
    # masked last row tile (no HBM-level pad/slice passes).
    N2, L2 = 3, 5
    x2 = jax.random.normal(jax.random.PRNGKey(1), (N2, L2, H), dtype=jnp.float32)
    ref2 = reference(x2, w1, b1, w2, b2)
    out2 = jax.block_until_ready(
        pointwise_feedforward(x2, w1, b1, w2, b2, tm=8, matmul_dtype=jnp.float32))
    assert out2.shape == (N2, L2, H)
    assert jnp.allclose(out2, ref2, atol=1e-5, rtol=1e-5), "ragged-grid mismatch"

    print("KERNEL_OK")
</pallas_src>

<mosaic_0001>
module attributes {stable_mosaic.version = 11 : i64} {
  func.func @_ffn_kernel(%arg0: i32, %arg1: memref<16x32xf32, #tpu.memory_space<vmem>>, %arg2: memref<32x128xf32, #tpu.memory_space<vmem>>, %arg3: memref<1x128xf32, #tpu.memory_space<vmem>>, %arg4: memref<128x32xf32, #tpu.memory_space<vmem>>, %arg5: memref<1x32xf32, #tpu.memory_space<vmem>>, %arg6: memref<16x32xf32, #tpu.memory_space<vmem>>) attributes {dimension_semantics = [#tpu.dimension_semantics<parallel>], iteration_bounds = array<i64: 1>, scalar_prefetch = 0 : i64, scratch_operands = 0 : i64, tpu.core_type = #tpu.core_type<tc>, window_params = [{transform_indices = @transform_0, window_bounds = array<i64: 16, 32>}, {pipeline_mode = #tpu.pipeline_mode<synchronous>, transform_indices = @transform_1, window_bounds = array<i64: 32, 128>}, {pipeline_mode = #tpu.pipeline_mode<synchronous>, transform_indices = @transform_2, window_bounds = array<i64: 1, 128>}, {pipeline_mode = #tpu.pipeline_mode<synchronous>, transform_indices = @transform_3, window_bounds = array<i64: 128, 32>}, {pipeline_mode = #tpu.pipeline_mode<synchronous>, transform_indices = @transform_4, window_bounds = array<i64: 1, 32>}, {transform_indices = @transform_5, window_bounds = array<i64: 16, 32>}]} {
    %c0 = arith.constant 0 : index
    %c0_0 = arith.constant 0 : index
    %0 = vector.load %arg1[%c0, %c0_0] : memref<16x32xf32, #tpu.memory_space<vmem>>, vector<16x32xf32>
    %c0_1 = arith.constant 0 : index
    %c0_2 = arith.constant 0 : index
    %1 = vector.load %arg2[%c0_1, %c0_2] : memref<32x128xf32, #tpu.memory_space<vmem>>, vector<32x128xf32>
    %cst = arith.constant dense<0.000000e+00> : vector<16x128xf32>
    %2 = tpu.matmul %0, %1, %cst {dimension_numbers = #tpu.dot_dimension_numbers<[1], [0], [0], [1], [0, 0, 1, 1], [], []>} : vector<16x32xf32>, vector<32x128xf32>, vector<16x128xf32> -> vector<16x128xf32>
    %c0_3 = arith.constant 0 : index
    %c0_4 = arith.constant 0 : index
    %3 = vector.load %arg3[%c0_3, %c0_4] : memref<1x128xf32, #tpu.memory_space<vmem>>, vector<1x128xf32>
    %4 = vector.broadcast %3 : vector<1x128xf32> to vector<16x128xf32>
    %5 = arith.addf %2, %4 : vector<16x128xf32>
    %cst_5 = arith.constant 0.000000e+00 : f32
    %6 = vector.broadcast %cst_5 : f32 to vector<16x128xf32>
    %7 = arith.maximumf %5, %6 : vector<16x128xf32>
    %c0_6 = arith.constant 0 : index
    %c0_7 = arith.constant 0 : index
    %8 = vector.load %arg4[%c0_6, %c0_7] : memref<128x32xf32, #tpu.memory_space<vmem>>, vector<128x32xf32>
    %cst_8 = arith.constant dense<0.000000e+00> : vector<16x32xf32>
    %9 = tpu.matmul %7, %8, %cst_8 {dimension_numbers = #tpu.dot_dimension_numbers<[1], [0], [0], [1], [0, 0, 1, 1], [], []>} : vector<16x128xf32>, vector<128x32xf32>, vector<16x32xf32> -> vector<16x32xf32>
    %c0_9 = arith.constant 0 : index
    %c0_10 = arith.constant 0 : index
    %10 = vector.load %arg5[%c0_9, %c0_10] : memref<1x32xf32, #tpu.memory_space<vmem>>, vector<1x32xf32>
    %11 = vector.broadcast %10 : vector<1x32xf32> to vector<16x32xf32>
    %12 = arith.addf %9, %11 : vector<16x32xf32>
    %13 = arith.addf %12, %0 : vector<16x32xf32>
    %c0_11 = arith.constant 0 : index
    %c0_12 = arith.constant 0 : index
    %14 = vector.load %arg6[%c0_11, %c0_12] : memref<16x32xf32, #tpu.memory_space<vmem>>, vector<16x32xf32>
    tpu.vector_store %arg6[%c0_11, %c0_12], %13 {strides = array<i32>} : memref<16x32xf32, #tpu.memory_space<vmem>>, vector<16x32xf32>,
    return
  }
  func.func @transform_0(%arg0: i32) -> (i32, i32) {
    %c0_i32 = arith.constant 0 : i32
    %c0_i32_0 = arith.constant 0 : i32
    return %arg0, %c0_i32 : i32, i32
  }
  func.func @transform_1(%arg0: i32) -> (i32, i32) {
    %c0_i32 = arith.constant 0 : i32
    %c0_i32_0 = arith.constant 0 : i32
    %c0_i32_1 = arith.constant 0 : i32
    return %c0_i32, %c0_i32_0 : i32, i32
  }
  func.func @transform_2(%arg0: i32) -> (i32, i32) {
    %c0_i32 = arith.constant 0 : i32
    %c0_i32_0 = arith.constant 0 : i32
    %c0_i32_1 = arith.constant 0 : i32
    return %c0_i32, %c0_i32_0 : i32, i32
  }
  func.func @transform_3(%arg0: i32) -> (i32, i32) {
    %c0_i32 = arith.constant 0 : i32
    %c0_i32_0 = arith.constant 0 : i32
    %c0_i32_1 = arith.constant 0 : i32
    return %c0_i32, %c0_i32_0 : i32, i32
  }
  func.func @transform_4(%arg0: i32) -> (i32, i32) {
    %c0_i32 = arith.constant 0 : i32
    %c0_i32_0 = arith.constant 0 : i32
    %c0_i32_1 = arith.constant 0 : i32
    return %c0_i32, %c0_i32_0 : i32, i32
  }
  func.func @transform_5(%arg0: i32) -> (i32, i32) {
    %c0_i32 = arith.constant 0 : i32
    %c0_i32_0 = arith.constant 0 : i32
    return %arg0, %c0_i32 : i32, i32
  }
}

</mosaic_0001>

<bundles_post_ra>
// kernel: tpu_custom_call.1
= control target key start
LH: loop header
LB: loop body
LE: loop exit
PB: predicated region body
PF: predicated region fallthrough
CT: control target
= control target key end

     0   :  { %vm34_vm0 = vcmask 261120   ;;  %s502_s0 = inlined_call_operand.vmem [shape: f32[16,32], index: 0, kind: input, shape index: {}]   ;;  %s503_s1 = inlined_call_operand.vmem [shape: f32[32,128], index: 1, kind: input, shape index: {}]   ;;  %s504_s2 = inlined_call_operand.vmem [shape: f32[1,128], index: 2, kind: input, shape index: {}]   ;;  %s505_s3 = inlined_call_operand.vmem [shape: f32[128,32], index: 3, kind: input, shape index: {}]   ;;  %s506_s4 = inlined_call_operand.vmem [shape: f32[1,32], index: 4, kind: input, shape index: {}]   ;;  %s507_s5 = inlined_call_operand.hbm [shape: f32[16,32], index: 5, kind: output, shape index: {}]  }
   0x1   :  { %v23_v0 = vld [vmem:[%s503_s1] sm:$0xff]  ;;  %v24_v1 = vld [vmem:[%s503_s1 + $0x8] sm:$0xff]  ;;  %v25_v2 = vld [vmem:[%s503_s1 + $0x10] sm:$0xff] }
   0x2   :  { %v310_v3 = vpack.c.bf16 %v24_v1, %v23_v0  ;;  %v26_v4 = vld [vmem:[%s503_s1 + $0x18] sm:$0xff]  ;;  %v425_v5 = vld [vmem:[%s502_s0] sm:$0xff]  ;;  %v119_v8 = vld [vmem:[%s505_s3 + $0x8] sm:$0xff] }
   0x3   :  { %v314_v6 = vpack.c.bf16 %v26_v4, %v25_v2  ;;  %272 = vmatprep.mubr.msk.f32.mxu0 %vm34_vm0, %v425_v5  ;;  %v118_v7 = vld [vmem:[%s505_s3] sm:$0xff]  ;;  %v120_v9 = vld [vmem:[%s505_s3 + $0x10] sm:$0xff]  ;;  %v121_v11 = vld [vmem:[%s505_s3 + $0x18] sm:$0xff] }
   0x4   :  { %311 = vmatprep.subr.bf16.mxu0 %v310_v3  ;;  %v318_v10 = vpack.c.bf16 %v119_v8, %v118_v7  ;;  %v322_v12 = vpack.c.bf16 %v121_v11, %v120_v9  ;;  %v122_v13 = vld [vmem:[%s505_s3 + $0x20] sm:$0xff]  ;;  %v123_v14 = vld [vmem:[%s505_s3 + $0x28] sm:$0xff] }
   0x5   :  { %313 = vmatpush3.bf16.msra.mxu0 %v310_v3 }
   0x6   :  { %315 = vmatprep.subr.bf16.mxu0 %v314_v6  ;;  %319 = vmatprep.subr.bf16.mxu1 %v318_v10 }
   0x7   :  { %321 = vmatpush3.bf16.msra.mxu1 %v318_v10 }
   0x8   :  { %10 = vsyncpa [#allocation3], 0  ;;  %323 = vmatprep.subr.bf16.mxu1 %v322_v12  ;;  %v326_v15 = vpack.c.bf16 %v123_v14, %v122_v13  ;;  %v22_v16 = vld [vmem:[%s502_s0 + $0x8] sm:$0xff]  ;;  %v124_v17 = vld [vmem:[%s505_s3 + $0x30] sm:$0xff] }
   0x9   :  { %317 = vmatpush3.bf16.msra.mxu0 %v314_v6  ;;  %v125_v18 = vld [vmem:[%s505_s3 + $0x38] sm:$0xff]  ;;  %v126_v20 = vld [vmem:[%s505_s3 + $0x40] sm:$0xff]  ;;  %v127_v21 = vld [vmem:[%s505_s3 + $0x48] sm:$0xff] }
   0xa   :  { %v330_v19 = vpack.c.bf16 %v125_v18, %v124_v17  ;;  %v334_v22 = vpack.c.bf16 %v127_v21, %v126_v20  ;;  %v128_v23 = vld [vmem:[%s505_s3 + $0x50] sm:$0xff]  ;;  %v129_v24 = vld [vmem:[%s505_s3 + $0x58] sm:$0xff]  ;;  %v130_v26 = vld [vmem:[%s505_s3 + $0x60] sm:$0xff] }
   0xb   :  { %325 = vmatpush3.bf16.msra.mxu1 %v322_v12  ;;  %v338_v25 = vpack.c.bf16 %v129_v24, %v128_v23  ;;  %v131_v27 = vld [vmem:[%s505_s3 + $0x68] sm:$0xff]  ;;  %v132_v29 = vld [vmem:[%s505_s3 + $0x70] sm:$0xff]  ;;  %v133_v30 = vld [vmem:[%s505_s3 + $0x78] sm:$0xff]  ;;  %s377_s3 = smov [#allocation2]  }
   0xc   :  { %273 = vmatmul.mubr.msk.f32.vlgmr.msra.gmra.mrb[0].mxu0 %vm34_vm0, %v22_v16  ;;  %327 = vmatprep.subr.bf16.mxu1 %v326_v15  ;;  %v342_v28 = vpack.c.bf16 %v131_v27, %v130_v26  ;;  %v346_v31 = vpack.c.bf16 %v133_v30, %v132_v29  ;;  %v236_v32 = vld [vmem:[%s504_s2] ss:$0 sm:$0xff]  ;;  %s225_s13 = sshll.u32 %s377_s3, 4  ;;  %s226_s13 = int_to_ptr.vmem [resolvable:$true] %s225_s13 }
   0xd   :  { %v239_v39 = vld [vmem:[%s506_s4] ss:$0 sm:$0xff]  ;;  %s353_s2 = scalar_lea.vmem %s226_s13, 256  ;;  %p358_p1 = scmp.lt.s32.totalorder %s226_s13, %s226_s13 }
   0xe   :  { %p354_p0 = scmp.ne.s32.totalorder %s226_s13, %s353_s2  ;;  %p359_p2 = scmp.lt.s32.totalorder %s353_s2, %s353_s2 }
   0xf   :  { %329 = vmatpush3.bf16.msra.mxu1 %v326_v15 }
  0x10   :  { %331 = vmatprep.subr.bf16.mxu1 %v330_v19  ;;  %p360_p3 = por %p359_p2, %p358_p1 }
  0x12   :  { %p361_p4 = pnand %p360_p3, %p354_p0 }
  0x13   :  { %333 = vmatpush3.bf16.msra.mxu1 %v330_v19 }
  0x14   :  { %335 = vmatprep.subr.bf16.mxu1 %v334_v22 }
  0x17   :  { %337 = vmatpush3.bf16.msra.mxu1 %v334_v22 }
  0x18   :  { %339 = vmatprep.subr.bf16.mxu1 %v338_v25 }
  0x1b   :  { %341 = vmatpush3.bf16.msra.mxu1 %v338_v25 }
  0x1c   :  { %343 = vmatprep.subr.bf16.mxu1 %v342_v28 }
  0x1f   :  { %345 = vmatpush3.bf16.msra.mxu1 %v342_v28 }
  0x20   :  { %347 = vmatprep.subr.bf16.mxu1 %v346_v31 }
  0x23   :  { %349 = vmatpush3.bf16.msra.mxu1 %v346_v31 }
  0xdf   :  { %v274_v33 = vpop.f32.mrb[0].mxu0 }
  0xe0   :  { %v113_v34 = vadd.f32 %v274_v33, %v236_v32  ;;  %v107_v35 = vpop.f32.mrb[1].mxu0 }
  0xe1   :  { %v108_v36 = vadd.f32 %v236_v32, %v107_v35 }
  0xe2   :  { %v117_v38 = vmax.f32 %v113_v34, 0.0 }
  0xe3   :  { %v116_v37 = vmax.f32 %v108_v36, 0.0 }
  0xe5   :  { %307 = vmatprep.mubr.f32.mxu1 %v116_v37 }
  0xe6   :  { %308 = vmatmul.mubr.f32.vlgmr.msra.gmra.mrb[0].mxu1 %v117_v38 }
 0x1b9   :  { %v309_v40 = vpop.f32.mrb[0].mxu1 }
 0x1ba   :  { %v213_v41 = vadd.f32 %v309_v40, %v239_v39  ;;  %v207_v42 = vpop.f32.mrb[1].mxu1 }
 0x1bb   :  { %v208_v43 = vadd.f32 %v239_v39, %v207_v42 }
 0x1bc   :  { %v217_v44 = vadd.f32 %v213_v41, %v22_v16 }
 0x1bd   :  { %v216_v45 = vadd.f32 %v208_v43, %v425_v5 }
 0x1be   :  { %219 = vst.msk [vmem:[#allocation2 + $0x8] sm:$0xff] %vm34_vm0, %v217_v44 }
 0x1bf   :  { %218 = vst.msk [vmem:[#allocation2] sm:$0xff] %vm34_vm0, %v216_v45 }
 0x1c0   :  { %364 = shalt.err (!%p361_p4)
}
 0x1c1   :  { %s365_s15 = scalar_lea.hbm %s507_s5, 256 }
 0x1c2   :  { %p366_p5 = scmp.ne.s32.totalorder %s507_s5, %s365_s15  ;;  %p369_p6 = scmp.lt.u32.totalorder %s365_s15, %s507_s5 }
 0x1c4   :  { %p371_p7 = pnand %p369_p6, %p366_p5 }
 0x1c6   :  { %374 = shalt.err (!%p371_p7)
}
 0x1c7   :  { %s378_s20 = smov 128   ;;  %s379_s21 = smov 8  }
 0x1c8   :  { %231 = dma.vmem_to_hbm [thread:$0]  %s226_s13, 256, %s507_s5, [#allocation3], %s378_s20, %s378_s20, %s379_s21  }
 0x1c9   :  { %375 = dma.done.wait [#allocation3], 256  }
 0x1ca   :  { %376 = vsyncadd [#allocation3], 4294967040 }
 0x1cb   :  { %235 = vsyncpa [#allocation3], 1 }

</bundles_post_ra>
